<compile_context>
chip_gen: v5e
topology: v5e:2x2
jax: 0.10.0
libtpu: 0.0.40
codegen_flags: <defaults>
</compile_context>

<pallas_src>
import functools

import jax
import jax.numpy as jnp
from jax.experimental import pallas as pl
from jax.experimental.pallas import tpu as pltpu


def _focal_weight_ce_kernel(x_ref, xt_ref, coeff_ref, out_ref, *,
                            batch, tile_b, tiles_per_p, need_mask):
    """Row-wise log-sum-exp over one (tile_b, C) logits block; accumulate the
    tile's partial loss into the resident out_ref accumulator."""
    t_idx = pl.program_id(1)

    # Zero the resident per-parallel-slice accumulator on the first step of
    # the reduction ("arbitrary") axis.
    @pl.when(t_idx == 0)
    def _():
        out_ref[...] = jnp.zeros_like(out_ref)

    # max / subtract in the native dtype (exact max; cheaper bf16 VALU on
    # v6e/v7x and half the live temp); exp / log-sum-exp in f32 on the EUP.
    x = x_ref[...]                                         # (tile_b, C) native
    m = jnp.max(x, axis=1, keepdims=True)                  # (tile_b, 1) native
    e = jnp.exp((x - m).astype(jnp.float32))               # (tile_b, C) f32
    lse = m.astype(jnp.float32) + jnp.log(
        jnp.sum(e, axis=1, keepdims=True))                 # (tile_b, 1) f32

    # log p[target] = x_t - lse ;  coeff = -(1-eps)/B * w[t] * sqrt(x_t)
    # (both gathered/precomputed in the wrapper at O(B) cost).
    loss_row = coeff_ref[...] * (xt_ref[...] - lse)        # (tile_b, 1) f32

    if need_mask:
        # Mask padded rows of a partial last tile and entire phantom tiles
        # (their block index was clamped in the index_map, but their *logical*
        # rows are >= batch, so they contribute exactly zero).
        lin = pl.program_id(0) * tiles_per_p + t_idx
        row = lin * tile_b + jax.lax.broadcasted_iota(jnp.int32, (tile_b, 1), 0)
        loss_row = jnp.where(row < batch, loss_row, 0.0)

    out_ref[...] += jnp.sum(loss_row)


def _vmem_capacity_bytes(default_bytes=64 * 1024 * 1024):
    """Trace-time VMEM capacity query with a conservative (v7x-safe) fallback."""
    try:
        info = pltpu.get_tpu_info()
        cap = getattr(info, "vmem_capacity_bytes", None)
        if cap:
            return int(cap)
    except Exception:
        pass
    return default_bytes


def _pick_tile_b(batch, num_classes, itemsize, budget_bytes):
    """Largest batch tile whose double-buffered logits block + live temps fit
    the generation-aware VMEM budget."""
    per_row = (2 * num_classes * itemsize      # double-buffered input block
               + 2 * num_classes * itemsize    # native-dtype temps (x, x - m)
               + 2 * num_classes * 4           # f32 temps (cast arg, exp)
               + 64)                           # per-row odds and ends
    tile = budget_bytes // max(per_row, 1)
    if tile >= batch:
        return batch                           # full extent: no 8-divisibility
    tile = (tile // 8) * 8
    if tile < 8:
        # TODO(synk): vocab-scale num_classes needs a class-chunked grid axis
        # with an online max/LSE accumulator instead of a class-resident tile.
        raise ValueError(
            f"num_classes={num_classes} is too large for a class-resident "
            f"tile within a {budget_bytes // 2**20} MiB VMEM budget.")
    return tile


def focal_weight_cross_entropy(inputs, targets, weight, epsilon=0.1,
                               tile_b=None):
    """Pallas implementation of FocalWeightCrossEntropy.forward.

    inputs:  (B, C) float logits (before softmax), any float dtype; kept in
             native dtype at HBM (bf16 halves the read traffic).
    targets: (B,)   integer class labels.
    weight:  (C,)   per-class weights.
    returns: scalar loss (float32).
    """
    B, C = inputs.shape
    itemsize = jnp.dtype(inputs.dtype).itemsize

    # Generation-aware VMEM budget: ~48 MiB on 128 MiB parts (v5e/v6e),
    # ~24 MiB on v7x's 64 MiB per-TensorCore VMEM.  Raise the scoped limit
    # to match so the bigger tiles actually compile.
    vmem_cap = _vmem_capacity_bytes()
    budget = min(vmem_cap * 3 // 8, 48 * 1024 * 1024)
    vmem_limit = int(min(budget + 16 * 1024 * 1024,
                         vmem_cap - 8 * 1024 * 1024))

    if tile_b is None:
        tile_b = _pick_tile_b(B, C, itemsize, budget)
    tile_b = min(int(tile_b), B)
    if tile_b < B:
        tile_b = max(8, (tile_b // 8) * 8)     # sublane-aligned when tiled

    num_tiles = pl.cdiv(B, tile_b)
    # Two-level grid: a small leading "parallel" axis (keeps v7x's two
    # TensorCores busy; free on single-TC v5e/v6e) over an inner "arbitrary"
    # reduction axis with a resident accumulator (one HBM writeback per slice).
    P = 2 if num_tiles >= 2 else 1
    tiles_per_p = pl.cdiv(num_tiles, P)
    need_mask = (P * tiles_per_p * tile_b) != B

    # O(B) wrapper work: gather target logit + class weight, apply sqrt and the
    # folded -(1 - eps)/B scale.  Removes all per-(B,C) select/gather work from
    # the kernel.  sqrt(x_t) is NaN for a negative target logit, matching
    # torch.pow(inputs, 0.5) at the target column.
    rows = jnp.arange(B)
    x_t = inputs[rows, targets].astype(jnp.float32)               # (B,)
    w_t = weight.astype(jnp.float32)[targets]                     # (B,)
    coeff = (-(1.0 - epsilon) / B) * w_t * jnp.sqrt(x_t)          # (B,)
    x_t2d = x_t.reshape(B, 1)
    coeff2d = coeff.reshape(B, 1)

    def block_row(p, t):
        # Clamp phantom tiles (when P * tiles_per_p > num_tiles) onto the last
        # real block; their rows are masked out inside the kernel.
        return (jnp.minimum(p * tiles_per_p + t, num_tiles - 1), 0)

    kernel = functools.partial(
        _focal_weight_ce_kernel, batch=B, tile_b=tile_b,
        tiles_per_p=tiles_per_p, need_mask=need_mask)

    partials = pl.pallas_call(
        kernel,
        out_shape=jax.ShapeDtypeStruct((P, 1, 128), jnp.float32),
        grid=(P, tiles_per_p),
        in_specs=[
            pl.BlockSpec((tile_b, C), block_row),    # logits (native dtype)
            pl.BlockSpec((tile_b, 1), block_row),    # target logit (f32)
            pl.BlockSpec((tile_b, 1), block_row),    # -(1-eps)/B * w_t * sqrt(x_t)
        ],
        out_specs=pl.BlockSpec((1, 1, 128), lambda p, t: (p, 0, 0)),
        compiler_params=pltpu.CompilerParams(
            dimension_semantics=("parallel", "arbitrary"),
            vmem_limit_bytes=vmem_limit),
        cost_estimate=pl.CostEstimate(
            flops=4 * B * C,
            transcendentals=B * C + 2 * B,
            bytes_accessed=B * C * itemsize + 8 * B + P * 512),
    )(inputs, x_t2d, coeff2d)

    # Tiny final reduction over the P resident accumulators (scale already
    # folded into coeff).
    return jnp.sum(partials[:, 0, 0])


def _reference(inputs, targets, weight, epsilon=0.1):
    # Pure-JAX reference mirroring the PyTorch forward exactly.
    x = inputs.astype(jnp.float32)
    log_probs = jax.nn.log_softmax(x, axis=1)
    smooth = jnp.sqrt(x)
    onehot = jax.nn.one_hot(targets, x.shape[1], dtype=jnp.float32)
    t = (1.0 - epsilon) * onehot
    w = weight.astype(jnp.float32)[None, :]
    return jnp.sum(jnp.mean(-t * log_probs * w * smooth, axis=0))


if __name__ == "__main__":
    key = jax.random.PRNGKey(0)
    k1, k2, k3 = jax.random.split(key, 3)

    # Case 1: module-native shapes (batch=8, num_classes=32), f32 logits.
    # Positive logits so torch.pow(inputs, 0.5) / sqrt is well defined.
    B, C = 8, 32
    inputs = jax.random.uniform(k1, (B, C), jnp.float32, minval=0.1, maxval=2.0)
    targets = jax.random.randint(k2, (B,), 0, C, dtype=jnp.int32)
    weight = jax.random.uniform(k3, (C,), jnp.float32, minval=0.5, maxval=1.5)

    loss = jax.block_until_ready(
        focal_weight_cross_entropy(inputs, targets, weight, epsilon=0.1))
    ref = _reference(inputs, targets, weight, epsilon=0.1)
    assert jnp.allclose(loss, ref, rtol=1e-5, atol=1e-5), (loss, ref)

    # Case 2: bf16 logits shipped in native dtype (half the HBM read traffic);
    # the in-kernel (x - m) subtraction now runs in bf16 (per v6e/v7x perf
    # feedback), so compare against the f32 reference at bf16-level tolerance.
    inputs_bf16 = inputs.astype(jnp.bfloat16)
    loss_bf16 = jax.block_until_ready(
        focal_weight_cross_entropy(inputs_bf16, targets, weight, epsilon=0.1))
    ref_bf16 = _reference(inputs_bf16, targets, weight, epsilon=0.1)
    assert jnp.allclose(loss_bf16, ref_bf16, rtol=1e-2, atol=1e-2), (
        loss_bf16, ref_bf16)

    # Case 3: multi-tile path with a partial last tile AND a phantom tile
    # (B=20, tile_b=8 -> 3 real tiles split 2x2 across the parallel axis).
    B2 = 20
    k4, k5 = jax.random.split(k1)
    inputs2 = jax.random.uniform(k4, (B2, C), jnp.float32, minval=0.1, maxval=2.0)
    targets2 = jax.random.randint(k5, (B2,), 0, C, dtype=jnp.int32)
    loss2 = jax.block_until_ready(
        focal_weight_cross_entropy(inputs2, targets2, weight, epsilon=0.1,
                                   tile_b=8))
    ref2 = _reference(inputs2, targets2, weight, epsilon=0.1)
    assert jnp.allclose(loss2, ref2, rtol=1e-5, atol=1e-5), (loss2, ref2)

    print("KERNEL_OK")
</pallas_src>

<mosaic_0001>
module attributes {stable_mosaic.version = 11 : i64} {
  func.func @_focal_weight_ce_kernel(%arg0: i32, %arg1: i32, %arg2: memref<8x32xf32, #tpu.memory_space<vmem>>, %arg3: memref<8x1xf32, #tpu.memory_space<vmem>>, %arg4: memref<8x1xf32, #tpu.memory_space<vmem>>, %arg5: memref<1x1x128xf32, #tpu.memory_space<vmem>>) attributes {dimension_semantics = [#tpu.dimension_semantics<parallel>, #tpu.dimension_semantics<arbitrary>], iteration_bounds = array<i64: 1, 1>, scalar_prefetch = 0 : i64, scratch_operands = 0 : i64, tpu.core_type = #tpu.core_type<tc>, window_params = [{transform_indices = @transform_0, window_bounds = array<i64: 8, 32>}, {transform_indices = @transform_1, window_bounds = array<i64: 8, 1>}, {transform_indices = @transform_2, window_bounds = array<i64: 8, 1>}, {transform_indices = @transform_3, window_bounds = array<i64: 1, 1, 128>}]} {
    %c0_i32 = arith.constant 0 : i32
    %0 = arith.cmpi eq, %arg1, %c0_i32 : i32
    %1 = arith.extui %0 : i1 to i32
    %c0_i32_0 = arith.constant 0 : i32
    %2 = arith.cmpi ne, %1, %c0_i32_0 : i32
    scf.if %2 {
      %cst_14 = arith.constant 0.000000e+00 : f32
      %25 = vector.broadcast %cst_14 : f32 to vector<1x1x128xf32>
      %c0_15 = arith.constant 0 : index
      %c0_16 = arith.constant 0 : index
      %c0_17 = arith.constant 0 : index
      %26 = vector.load %arg5[%c0_15, %c0_16, %c0_17] : memref<1x1x128xf32, #tpu.memory_space<vmem>>, vector<1x1x128xf32>
      tpu.vector_store %arg5[%c0_15, %c0_16, %c0_17], %25 {strides = array<i32>} : memref<1x1x128xf32, #tpu.memory_space<vmem>>, vector<1x1x128xf32>,
    } else {
    }
    %c0 = arith.constant 0 : index
    %c0_1 = arith.constant 0 : index
    %3 = vector.load %arg2[%c0, %c0_1] : memref<8x32xf32, #tpu.memory_space<vmem>>, vector<8x32xf32>
    %cst = arith.constant dense<0xFF800000> : vector<8xf32>
    %4 = vector.multi_reduction <maximumf>, %3, %cst [1] : vector<8x32xf32> to vector<8xf32>
    %5 = vector.shape_cast %4 : vector<8xf32> to vector<8x1xf32>
    %6 = vector.broadcast %5 : vector<8x1xf32> to vector<8x32xf32>
    %7 = arith.subf %3, %6 : vector<8x32xf32>
    %8 = math.exp %7 : vector<8x32xf32>
    %cst_2 = arith.constant dense<0.000000e+00> : vector<8xf32>
    %9 = vector.multi_reduction <add>, %8, %cst_2 [1] : vector<8x32xf32> to vector<8xf32>
    %10 = vector.shape_cast %9 : vector<8xf32> to vector<8x1xf32>
    %11 = math.log %10 : vector<8x1xf32>
    %12 = arith.addf %5, %11 : vector<8x1xf32>
    %c0_3 = arith.constant 0 : index
    %c0_4 = arith.constant 0 : index
    %13 = vector.load %arg4[%c0_3, %c0_4] : memref<8x1xf32, #tpu.memory_space<vmem>>, vector<8x1xf32>
    %c0_5 = arith.constant 0 : index
    %c0_6 = arith.constant 0 : index
    %14 = vector.load %arg3[%c0_5, %c0_6] : memref<8x1xf32, #tpu.memory_space<vmem>>, vector<8x1xf32>
    %15 = arith.subf %14, %12 : vector<8x1xf32>
    %16 = arith.mulf %13, %15 : vector<8x1xf32>
    %c0_7 = arith.constant 0 : index
    %c0_8 = arith.constant 0 : index
    %c0_9 = arith.constant 0 : index
    %17 = vector.load %arg5[%c0_7, %c0_8, %c0_9] : memref<1x1x128xf32, #tpu.memory_space<vmem>>, vector<1x1x128xf32>
    %18 = vector.shape_cast %16 : vector<8x1xf32> to vector<1x8x1xf32>
    %cst_10 = arith.constant dense<0.000000e+00> : vector<1xf32>
    %19 = vector.multi_reduction <add>, %18, %cst_10 [1, 2] : vector<1x8x1xf32> to vector<1xf32>
    %20 = vector.shape_cast %19 : vector<1xf32> to vector<1x1x1xf32>
    %21 = vector.extract %20[0, 0, 0] : f32 from vector<1x1x1xf32>
    %22 = vector.broadcast %21 : f32 to vector<1x1x128xf32>
    %23 = arith.addf %17, %22 : vector<1x1x128xf32>
    %c0_11 = arith.constant 0 : index
    %c0_12 = arith.constant 0 : index
    %c0_13 = arith.constant 0 : index
    %24 = vector.load %arg5[%c0_11, %c0_12, %c0_13] : memref<1x1x128xf32, #tpu.memory_space<vmem>>, vector<1x1x128xf32>
    tpu.vector_store %arg5[%c0_11, %c0_12, %c0_13], %23 {strides = array<i32>} : memref<1x1x128xf32, #tpu.memory_space<vmem>>, vector<1x1x128xf32>,
    return
  }
  func.func @transform_0(%arg0: i32, %arg1: i32) -> (i32, i32) {
    %c1_i32 = arith.constant 1 : i32
    %0 = arith.muli %arg0, %c1_i32 : i32
    %1 = arith.addi %0, %arg1 : i32
    %c0_i32 = arith.constant 0 : i32
    %2 = arith.minsi %1, %c0_i32 : i32
    %c0_i32_0 = arith.constant 0 : i32
    %c0_i32_1 = arith.constant 0 : i32
    return %2, %c0_i32_0 : i32, i32
  }
  func.func @transform_1(%arg0: i32, %arg1: i32) -> (i32, i32) {
    %c1_i32 = arith.constant 1 : i32
    %0 = arith.muli %arg0, %c1_i32 : i32
    %1 = arith.addi %0, %arg1 : i32
    %c0_i32 = arith.constant 0 : i32
    %2 = arith.minsi %1, %c0_i32 : i32
    %c0_i32_0 = arith.constant 0 : i32
    %c0_i32_1 = arith.constant 0 : i32
    return %2, %c0_i32_0 : i32, i32
  }
  func.func @transform_2(%arg0: i32, %arg1: i32) -> (i32, i32) {
    %c1_i32 = arith.constant 1 : i32
    %0 = arith.muli %arg0, %c1_i32 : i32
    %1 = arith.addi %0, %arg1 : i32
    %c0_i32 = arith.constant 0 : i32
    %2 = arith.minsi %1, %c0_i32 : i32
    %c0_i32_0 = arith.constant 0 : i32
    %c0_i32_1 = arith.constant 0 : i32
    return %2, %c0_i32_0 : i32, i32
  }
  func.func @transform_3(%arg0: i32, %arg1: i32) -> (i32, i32, i32) {
    %c0_i32 = arith.constant 0 : i32
    %c0_i32_0 = arith.constant 0 : i32
    %c0_i32_1 = arith.constant 0 : i32
    return %arg0, %c0_i32, %c0_i32_0 : i32, i32, i32
  }
}

</mosaic_0001>

<bundles_post_ra>
// kernel: tpu_custom_call.1
= control target key start
LH: loop header
LB: loop body
LE: loop exit
PB: predicated region body
PF: predicated region fallthrough
CT: control target
= control target key end

     0   :  { %vm102_vm0 = vcmask 261120   ;;  %s236_s0 = inlined_call_operand.vmem [shape: f32[8,32], index: 0, kind: input, shape index: {}]   ;;  %s237_s1 = inlined_call_operand.vmem [shape: f32[8,1], index: 1, kind: input, shape index: {}]   ;;  %s238_s2 = inlined_call_operand.vmem [shape: f32[8,1], index: 2, kind: input, shape index: {}]   ;;  %s239_s3 = inlined_call_operand.hbm [shape: f32[1,1,128], index: 3, kind: output, shape index: {}]  }
   0x1   :  { %v101_v0 = vld [vmem:[%s236_s0] sm:$0xff] }
   0x2   :  { %8 = vsyncpa [#allocation3], 0  ;;  %v103_v1 = vsel %vm102_vm0, %v101_v0, -inf  ;;  %v116_v10 = vld [vmem:[%s237_s1] sm:$0xff]  ;;  %vm120_vm1 = vcmask 7168   ;;  %v202_v16 = vmov 0.0  }
   0x3   :  { %104 = vmax.xlane.f32.xlu0 %v103_v1  ;;  %v115_v12 = vld [vmem:[%s238_s2] sm:$0xff]  ;;  %100 = vst [vmem:[#allocation2] sm:$0x1] %v202_v16  ;;  %s203_s1 = smov [#allocation2]   ;;  %s141_s19 = sshll.u32 %s239_s3, 4  ;;  %s142_s19 = int_to_ptr.hbm [resolvable:$true] %s141_s19 }
   0x4   :  { %s139_s17 = sshll.u32 %s203_s1, 4  ;;  %s140_s17 = int_to_ptr.vmem [resolvable:$true] %s139_s17 }
   0xa   :  { %v119_v24 = vld [vmem:[#allocation2] sm:$0x1] }
  0x76   :  { %v105_v2 = vpop.xlane.xlu0 %104 }
  0x77   :  { %v106_v3 = vsub.f32 %v101_v0, %v105_v2 }
  0x79   :  { %v107_v4 = vmul.f32 1.442695, %v106_v3 }
  0x7b   :  { %172 = vpow2.f32 %v107_v4 }
  0x81   :  { %v173_v5 = vpop.eup %172 }
  0x82   :  { %v109_v6 = vsel %vm102_vm0, %v173_v5, 0.0 }
  0x83   :  { %110 = vadd.xlane.f32.xlu0 %v109_v6 }
  0xf6   :  { %v111_v7 = vpop.xlane.xlu0 %110 }
  0xf7   :  { %174 = vlog2.f32 %v111_v7 }
  0xfd   :  { %v175_v8 = vpop.eup %174 }
  0xfe   :  { %v113_v9 = vmul.f32 0.6931472, %v175_v8 }
 0x100   :  { %v114_v11 = vadd.f32 %v113_v9, %v105_v2 }
 0x102   :  { %v117_v13 = vsub.f32 %v116_v10, %v114_v11 }
 0x104   :  { %v118_v14 = vmul.f32 %v117_v13, %v115_v12 }
 0x106   :  { %v121_v15 = vsel %vm120_vm1, %v118_v14, 0.0 }
 0x107   :  { %122 = vadd.xlane.f32.xlu1 %v121_v15 }
 0x17a   :  { %v123_v17 = vpop.xlane.xlu1 %122 }
 0x17b   :  { %v124_v18 = vrot.slane %v123_v17, 4 }
 0x17d   :  { %v125_v19 = vadd.f32 %v124_v18, %v123_v17 }
 0x17f   :  { %v126_v20 = vrot.slane %v125_v19, 2 }
 0x181   :  { %v127_v21 = vadd.f32 %v126_v20, %v125_v19 }
 0x183   :  { %v128_v22 = vrot.slane %v127_v21, 1 }
 0x185   :  { %v129_v23 = vadd.f32 %v128_v22, %v127_v21 }
 0x187   :  { %168 = vpush %v129_v23 }
 0x1b8   :  { %s169_s20 = spop %168 }
 0x1b9   :  { %v131_v25 = vstv %s169_s20 }
 0x1ba   :  { %v132_v26 = vadd.f32 %v131_v25, %v119_v24 }
 0x1bc   :  { %133 = vst [vmem:[#allocation2] sm:$0x1] %v132_v26 }
 0x1bd   :  { %144 = dma.vmem_to_hbm [thread:$0]  %s140_s17, 16, %s142_s19, [#allocation3]  }
 0x1be   :  { %200 = dma.done.wait [#allocation3], 16  }
 0x1bf   :  { %201 = vsyncadd [#allocation3], 4294967280 }
 0x1c0   :  { %149 = vsyncpa [#allocation3], 1 }

</bundles_post_ra>
